<compile_context>
chip_gen: v6e
topology: v6e:2x2x1
jax: 0.10.0
libtpu: 0.0.40
codegen_flags: <defaults>
</compile_context>

<pallas_src>
import math
import numpy as np
import jax
import jax.numpy as jnp
from jax import lax
from jax.experimental import pallas as pl
from jax.experimental.pallas import tpu as pltpu


# ----------------------------------------------------------------------------- kernel
def _make_kernel(n_sub, pool_dtype):
    def kernel(x_ref, w1_ref, b1_ref, w2_ref, b2_ref, w3_ref, b3_ref,
               wf1_ref, bf1_ref, wf2_ref, bf2_ref, o_ref):
        f32 = jnp.float32
        cdt = w1_ref.dtype                    # matmul-operand dtype (f32 or bf16)
        pdt = pool_dtype                      # dtype of the pool/ReLU elementwise chain
        tb = x_ref.shape[0]
        sub = tb // n_sub

        # Static unroll over independent row halves: MXU work of one half overlaps the
        # VPU pool/ReLU work of the other (n_sub == 1 for small / unaligned tiles).
        for h in range(n_sub):
            rows = slice(h * sub, (h + 1) * sub)
            xs = x_ref[rows, :].astype(cdt)                       # (sub, 30) raw 5x6 images

            # conv1 (1->32, k=3, pad=1) + bias + ReLU + max_pool2d((2,3)), fused.
            # Toeplitz columns are ordered col = k*128 + g*32 + c (k = pool-window slot,
            # g = pooled pixel, c = channel) so the pool is a running max over six
            # 128-lane-aligned sub-matmuls; only a (sub,128) intermediate stays live.
            p1 = None
            for k in range(6):
                cols = slice(k * 128, (k + 1) * 128)
                a = jnp.dot(xs, w1_ref[:, cols], preferred_element_type=f32)
                a = jnp.maximum(a + b1_ref[:, cols], 0.0).astype(pdt)
                p1 = a if p1 is None else jnp.maximum(p1, a)      # (sub, 128), lanes = g*32+c

            # conv2 (32->64, k=3, pad=1) on the 2x2 pooled grid + ReLU: one dense matmul.
            a2 = jnp.dot(p1.astype(cdt), w2_ref[...], preferred_element_type=f32)
            a2 = jnp.maximum(a2 + b2_ref[...], 0.0).astype(pdt)   # (sub, 256), lanes = g*64+c

            # max_pool2d(2): max over the 4 conv2 output pixels.
            m2 = jnp.maximum(jnp.maximum(a2[:, 0:64], a2[:, 64:128]),
                             jnp.maximum(a2[:, 128:192], a2[:, 192:256]))   # (sub, 64)

            # conv3 (64->128, k=3, pad=1) on a 1x1 input: only the center tap sees data.
            a3 = jnp.dot(m2.astype(cdt), w3_ref[...], preferred_element_type=f32)
            a3 = jnp.maximum(a3 + b3_ref[...], 0.0)               # (sub, 128) f32

            # fc1 + ReLU, fc2 (output dim padded 2 -> 8).
            f1 = jnp.dot(a3.astype(cdt), wf1_ref[...], preferred_element_type=f32)
            f1 = jnp.maximum(f1 + bf1_ref[...], 0.0)              # (sub, 256)
            f2 = jnp.dot(f1.astype(cdt), wf2_ref[...], preferred_element_type=f32)
            f2 = f2 + bf2_ref[...]                                # (sub, 8)

            # Packed, transposed store: (8, sub) slice of the lane-dense (8, tb) output block.
            o_ref[:, rows] = f2.T.astype(o_ref.dtype)

    return kernel


# ----------------------------------------------------------------------------- wrapper
def _round_up(n, m):
    return ((n + m - 1) // m) * m


def _choose_tile(B, tb_max):
    """Pick (tb, B_pad).

    B <= 128: single grid step, block == full array (any multiple of 8 is legal).
    Otherwise tb is a multiple of 128 (keeps the packed-output blocks lane-dense), chosen to
    (a) minimize batch padding, (b) keep >= 2 grid steps so "parallel" feeds both v7x
    TensorCores, (c) among ties, use the fewest steps (largest tb <= tb_max)."""
    if B <= 128:
        tb = _round_up(max(B, 8), 8)
        return tb, tb
    tb_max = max(128, _round_up(tb_max, 128))
    best = None
    for tb in range(128, tb_max + 1, 128):
        b_pad = _round_up(B, tb)
        steps = b_pad // tb
        key = (b_pad, steps < 2, steps)
        if best is None or key < best[0]:
            best = (key, tb, b_pad)
    return best[1], best[2]


def cnn_binary_classifier(x, kparams, tb=None, tb_max=512, pool_dtype=jnp.float32):
    """x: (..., 30) flattened 5x6 images -> logits (B, 2). Matches torch x.view(-1, 1, 5, 6)."""
    x = jnp.asarray(x, jnp.float32).reshape(-1, 30)
    B = x.shape[0]

    if tb is None:
        tb, B_pad = _choose_tile(B, tb_max)
    else:
        tb = _round_up(tb, 8)
        if _round_up(B, tb) > tb:             # multi-step grid -> lane-dense output blocks
            tb = _round_up(tb, 128)
        B_pad = _round_up(B, tb)
    if B_pad != B:
        x = jnp.pad(x, ((0, B_pad - B), (0, 0)))

    n_sub = 2 if tb % 256 == 0 else 1         # 2-half ILP split keeps 128-lane-aligned stores

    def resident(a):                          # full-array block with constant index map
        return pl.BlockSpec(a.shape, lambda i, _nd=a.ndim: (0,) * _nd)

    param_bytes = sum(int(a.size) * a.dtype.itemsize for a in kparams)
    cost = pl.CostEstimate(
        flops=2 * 98816 * B_pad,              # MACs/sample: 23040+32768+8192+32768+2048
        transcendentals=0,
        bytes_accessed=B_pad * (30 * 4 + 8 * 4) + param_bytes)

    out = pl.pallas_call(
        _make_kernel(n_sub, pool_dtype),
        out_shape=jax.ShapeDtypeStruct((8, B_pad), jnp.float32),   # packed, transposed logits
        grid_spec=pltpu.PrefetchScalarGridSpec(
            num_scalar_prefetch=0,
            grid=(B_pad // tb,),
            in_specs=[pl.BlockSpec((tb, 30), lambda i: (i, 0))]    # raw input, no im2col
                     + [resident(a) for a in kparams],             # resident weights/biases
            out_specs=pl.BlockSpec((8, tb), lambda i: (0, i)),     # lane-dense packed block
        ),
        compiler_params=pltpu.CompilerParams(dimension_semantics=("parallel",)),
        cost_estimate=cost,
    )(x, *kparams)
    return out[:2, :B].T


# ----------------------------------------------------------------------------- params
def init_params(key):
    """Deterministic PyTorch-like (uniform +-1/sqrt(fan_in)) init for all layers."""
    ks = jax.random.split(key, 10)

    def u(k, shape, fan_in):
        bound = 1.0 / math.sqrt(fan_in)
        return jax.random.uniform(k, shape, jnp.float32, -bound, bound)

    conv1_w = u(ks[0], (32, 1, 3, 3), 1 * 9);    conv1_b = u(ks[1], (32,), 1 * 9)
    conv2_w = u(ks[2], (64, 32, 3, 3), 32 * 9);  conv2_b = u(ks[3], (64,), 32 * 9)
    conv3_w = u(ks[4], (128, 64, 3, 3), 64 * 9); conv3_b = u(ks[5], (128,), 64 * 9)
    fc1_w   = u(ks[6], (256, 128), 128);         fc1_b   = u(ks[7], (256,), 128)
    fc2_w   = u(ks[8], (2, 256), 256);           fc2_b   = u(ks[9], (2,), 256)
    return dict(conv1=(conv1_w, conv1_b), conv2=(conv2_w, conv2_b),
                conv3=(conv3_w, conv3_b), fc1=(fc1_w, fc1_b), fc2=(fc2_w, fc2_b))


def pack_kernel_params(p, dtype=jnp.float32):
    """Re-layout PyTorch-shaped weights into the dense matmul operands the kernel uses.

    dtype: matmul-operand dtype. jnp.bfloat16 is recommended on every generation (the MXU is
    bf16-native with f32 accumulation); biases stay float32 since accumulation is float32.
    """
    c1w, c1b = p["conv1"]; c2w, c2b = p["conv2"]; c3w, c3b = p["conv3"]
    f1w, f1b = p["fc1"];   f2w, f2b = p["fc2"]

    c1w_np = np.asarray(c1w, np.float32); c1b_np = np.asarray(c1b, np.float32)
    c2w_np = np.asarray(c2w, np.float32); c2b_np = np.asarray(c2b, np.float32)

    # conv1 Toeplitz (zero padding folded in), columns ordered for the (2,3) max-pool:
    #   col = k*128 + g*32 + c ; g = pooled pixel (ph,pw)=divmod(g,2), k = (i,j)=divmod(k,3)
    #   conv1 output pixel: h = 2*ph + i, w = 3*pw + j   (image row 4 is dropped by the pool)
    w1 = np.zeros((30, 768), np.float32)
    b1 = np.zeros((1, 768), np.float32)
    for g in range(4):
        ph, pw = divmod(g, 2)
        for k in range(6):
            i, j = divmod(k, 3)
            h, w = 2 * ph + i, 3 * pw + j
            col0 = k * 128 + g * 32
            b1[0, col0:col0 + 32] = c1b_np
            for dh in range(3):
                for dw in range(3):
                    hi, wi = h + dh - 1, w + dw - 1
                    if 0 <= hi < 5 and 0 <= wi < 6:
                        w1[hi * 6 + wi, col0:col0 + 32] += c1w_np[:, 0, dh, dw]

    # conv2 as one dense (128, 256) matmul: every (input pixel, output pixel) pair of the
    # 2x2 grid maps to exactly one 3x3 tap (pad=1), so all 16 blocks are filled.
    w2 = np.zeros((128, 256), np.float32)
    b2 = np.zeros((1, 256), np.float32)
    for go in range(4):
        ho, wo = divmod(go, 2)
        b2[0, go * 64:(go + 1) * 64] = c2b_np
        for gi in range(4):
            hi, wi = divmod(gi, 2)
            dh, dw = hi - ho + 1, wi - wo + 1
            w2[gi * 32:(gi + 1) * 32, go * 64:(go + 1) * 64] = c2w_np[:, :, dh, dw].T

    # conv3 center tap only (1x1 input, pad=1).
    w3 = np.asarray(c3w, np.float32)[:, :, 1, 1].T          # (64, 128)
    b3 = np.asarray(c3b, np.float32).reshape(1, 128)

    wf1 = np.asarray(f1w, np.float32).T                     # (128, 256)
    bf1 = np.asarray(f1b, np.float32).reshape(1, 256)

    # fc2 padded to 8 output columns (cols 2..7 stay exactly zero); the wrapper keeps [:2].
    wf2 = np.zeros((256, 8), np.float32); wf2[:, :2] = np.asarray(f2w, np.float32).T
    bf2 = np.zeros((1, 8), np.float32);   bf2[0, :2] = np.asarray(f2b, np.float32)

    cast = lambda a: jnp.asarray(a, dtype)
    f32c = lambda a: jnp.asarray(a, jnp.float32)
    return (cast(w1), f32c(b1), cast(w2), f32c(b2), cast(w3), f32c(b3),
            cast(wf1), f32c(bf1), cast(wf2), f32c(bf2))


# ----------------------------------------------------------------------------- reference
def reference_forward(x, p):
    """Pure-JAX reference mirroring the PyTorch module exactly."""
    B = x.shape[0]
    h = x.reshape(B, 1, 5, 6).astype(jnp.float32)

    def conv(h, w, b):
        y = lax.conv_general_dilated(h, w, (1, 1), ((1, 1), (1, 1)),
                                     dimension_numbers=("NCHW", "OIHW", "NCHW"))
        return y + b.reshape(1, -1, 1, 1)

    def maxpool(h, kh, kw):
        return lax.reduce_window(h, -jnp.inf, lax.max,
                                 (1, 1, kh, kw), (1, 1, kh, kw), "VALID")

    h = jax.nn.relu(conv(h, *p["conv1"]))
    h = maxpool(h, 2, 3)
    h = jax.nn.relu(conv(h, *p["conv2"]))
    h = maxpool(h, 2, 2)
    h = jax.nn.relu(conv(h, *p["conv3"]))
    h = h.reshape(B, 128)
    h = jax.nn.relu(h @ p["fc1"][0].T + p["fc1"][1])
    return h @ p["fc2"][0].T + p["fc2"][1]


# ----------------------------------------------------------------------------- main
if __name__ == "__main__":
    key = jax.random.PRNGKey(0)
    pkey, xkey = jax.random.split(key)
    params = init_params(pkey)

    # 1) f32 operands, tiny batch (single-step grid): strict check.
    B = 2
    x = jax.random.normal(xkey, (B, 30), dtype=jnp.float32)  # forward views to (-1, 1, 5, 6)
    ref = reference_forward(x, params)
    kparams_f32 = pack_kernel_params(params, dtype=jnp.float32)
    out = jax.block_until_ready(cnn_binary_classifier(x, kparams_f32))
    assert out.shape == (B, 2)
    np.testing.assert_allclose(np.asarray(out), np.asarray(ref), rtol=1e-4, atol=1e-4)

    # 2) f32 operands, multi-step grid with batch padding + 2-half ILP split (tb=256): strict.
    B2 = 300
    x2 = jax.random.normal(jax.random.PRNGKey(1), (B2, 30), dtype=jnp.float32)
    ref2 = reference_forward(x2, params)
    out2 = jax.block_until_ready(cnn_binary_classifier(x2, kparams_f32, tb=256))
    assert out2.shape == (B2, 2)
    np.testing.assert_allclose(np.asarray(out2), np.asarray(ref2), rtol=1e-4, atol=1e-4)

    # 3) bf16 matmul operands + bf16 pooling (v6e/v7x recommendation; use pool_dtype=f32 on v5e).
    kparams_bf16 = pack_kernel_params(params, dtype=jnp.bfloat16)
    out_bf16 = jax.block_until_ready(
        cnn_binary_classifier(x, kparams_bf16, pool_dtype=jnp.bfloat16))
    np.testing.assert_allclose(np.asarray(out_bf16), np.asarray(ref), rtol=0.1, atol=0.1)

    print("KERNEL_OK")
</pallas_src>

<mosaic_0001>
module attributes {stable_mosaic.version = 11 : i64} {
  func.func @kernel(%arg0: i32, %arg1: memref<8x30xf32, #tpu.memory_space<vmem>>, %arg2: memref<30x768xf32, #tpu.memory_space<vmem>>, %arg3: memref<1x768xf32, #tpu.memory_space<vmem>>, %arg4: memref<128x256xf32, #tpu.memory_space<vmem>>, %arg5: memref<1x256xf32, #tpu.memory_space<vmem>>, %arg6: memref<64x128xf32, #tpu.memory_space<vmem>>, %arg7: memref<1x128xf32, #tpu.memory_space<vmem>>, %arg8: memref<128x256xf32, #tpu.memory_space<vmem>>, %arg9: memref<1x256xf32, #tpu.memory_space<vmem>>, %arg10: memref<256x8xf32, #tpu.memory_space<vmem>>, %arg11: memref<1x8xf32, #tpu.memory_space<vmem>>, %arg12: memref<8x8xf32, #tpu.memory_space<vmem>>) attributes {dimension_semantics = [#tpu.dimension_semantics<parallel>], iteration_bounds = array<i64: 1>, scalar_prefetch = 0 : i64, scratch_operands = 0 : i64, tpu.core_type = #tpu.core_type<tc>, window_params = [{transform_indices = @transform_0, window_bounds = array<i64: 8, 30>}, {pipeline_mode = #tpu.pipeline_mode<synchronous>, transform_indices = @transform_1, window_bounds = array<i64: 30, 768>}, {pipeline_mode = #tpu.pipeline_mode<synchronous>, transform_indices = @transform_2, window_bounds = array<i64: 1, 768>}, {pipeline_mode = #tpu.pipeline_mode<synchronous>, transform_indices = @transform_3, window_bounds = array<i64: 128, 256>}, {pipeline_mode = #tpu.pipeline_mode<synchronous>, transform_indices = @transform_4, window_bounds = array<i64: 1, 256>}, {pipeline_mode = #tpu.pipeline_mode<synchronous>, transform_indices = @transform_5, window_bounds = array<i64: 64, 128>}, {pipeline_mode = #tpu.pipeline_mode<synchronous>, transform_indices = @transform_6, window_bounds = array<i64: 1, 128>}, {pipeline_mode = #tpu.pipeline_mode<synchronous>, transform_indices = @transform_7, window_bounds = array<i64: 128, 256>}, {pipeline_mode = #tpu.pipeline_mode<synchronous>, transform_indices = @transform_8, window_bounds = array<i64: 1, 256>}, {pipeline_mode = #tpu.pipeline_mode<synchronous>, transform_indices = @transform_9, window_bounds = array<i64: 256, 8>}, {pipeline_mode = #tpu.pipeline_mode<synchronous>, transform_indices = @transform_10, window_bounds = array<i64: 1, 8>}, {transform_indices = @transform_11, window_bounds = array<i64: 8, 8>}]} {
    %c0 = arith.constant 0 : index
    %c0_0 = arith.constant 0 : index
    %0 = vector.load %arg1[%c0, %c0_0] : memref<8x30xf32, #tpu.memory_space<vmem>>, vector<8x30xf32>
    %c0_1 = arith.constant 0 : index
    %c0_2 = arith.constant 0 : index
    %1 = vector.load %arg2[%c0_1, %c0_2] : memref<30x768xf32, #tpu.memory_space<vmem>>, vector<30x128xf32>
    %cst = arith.constant dense<0.000000e+00> : vector<8x128xf32>
    %2 = tpu.matmul %0, %1, %cst {dimension_numbers = #tpu.dot_dimension_numbers<[1], [0], [0], [1], [0, 0, 1, 1], [], []>} : vector<8x30xf32>, vector<30x128xf32>, vector<8x128xf32> -> vector<8x128xf32>
    %c0_3 = arith.constant 0 : index
    %c0_4 = arith.constant 0 : index
    %3 = vector.load %arg3[%c0_3, %c0_4] : memref<1x768xf32, #tpu.memory_space<vmem>>, vector<1x128xf32>
    %4 = vector.broadcast %3 : vector<1x128xf32> to vector<8x128xf32>
    %5 = arith.addf %2, %4 : vector<8x128xf32>
    %cst_5 = arith.constant 0.000000e+00 : f32
    %6 = vector.broadcast %cst_5 : f32 to vector<8x128xf32>
    %7 = arith.maximumf %5, %6 : vector<8x128xf32>
    %c0_6 = arith.constant 0 : index
    %c128 = arith.constant 128 : index
    %8 = vector.load %arg2[%c0_6, %c128] : memref<30x768xf32, #tpu.memory_space<vmem>>, vector<30x128xf32>
    %cst_7 = arith.constant dense<0.000000e+00> : vector<8x128xf32>
    %9 = tpu.matmul %0, %8, %cst_7 {dimension_numbers = #tpu.dot_dimension_numbers<[1], [0], [0], [1], [0, 0, 1, 1], [], []>} : vector<8x30xf32>, vector<30x128xf32>, vector<8x128xf32> -> vector<8x128xf32>
    %c0_8 = arith.constant 0 : index
    %c128_9 = arith.constant 128 : index
    %10 = vector.load %arg3[%c0_8, %c128_9] : memref<1x768xf32, #tpu.memory_space<vmem>>, vector<1x128xf32>
    %11 = vector.broadcast %10 : vector<1x128xf32> to vector<8x128xf32>
    %12 = arith.addf %9, %11 : vector<8x128xf32>
    %cst_10 = arith.constant 0.000000e+00 : f32
    %13 = vector.broadcast %cst_10 : f32 to vector<8x128xf32>
    %14 = arith.maximumf %12, %13 : vector<8x128xf32>
    %15 = arith.maximumf %7, %14 : vector<8x128xf32>
    %c0_11 = arith.constant 0 : index
    %c256 = arith.constant 256 : index
    %16 = vector.load %arg2[%c0_11, %c256] : memref<30x768xf32, #tpu.memory_space<vmem>>, vector<30x128xf32>
    %cst_12 = arith.constant dense<0.000000e+00> : vector<8x128xf32>
    %17 = tpu.matmul %0, %16, %cst_12 {dimension_numbers = #tpu.dot_dimension_numbers<[1], [0], [0], [1], [0, 0, 1, 1], [], []>} : vector<8x30xf32>, vector<30x128xf32>, vector<8x128xf32> -> vector<8x128xf32>
    %c0_13 = arith.constant 0 : index
    %c256_14 = arith.constant 256 : index
    %18 = vector.load %arg3[%c0_13, %c256_14] : memref<1x768xf32, #tpu.memory_space<vmem>>, vector<1x128xf32>
    %19 = vector.broadcast %18 : vector<1x128xf32> to vector<8x128xf32>
    %20 = arith.addf %17, %19 : vector<8x128xf32>
    %cst_15 = arith.constant 0.000000e+00 : f32
    %21 = vector.broadcast %cst_15 : f32 to vector<8x128xf32>
    %22 = arith.maximumf %20, %21 : vector<8x128xf32>
    %23 = arith.maximumf %15, %22 : vector<8x128xf32>
    %c0_16 = arith.constant 0 : index
    %c384 = arith.constant 384 : index
    %24 = vector.load %arg2[%c0_16, %c384] : memref<30x768xf32, #tpu.memory_space<vmem>>, vector<30x128xf32>
    %cst_17 = arith.constant dense<0.000000e+00> : vector<8x128xf32>
    %25 = tpu.matmul %0, %24, %cst_17 {dimension_numbers = #tpu.dot_dimension_numbers<[1], [0], [0], [1], [0, 0, 1, 1], [], []>} : vector<8x30xf32>, vector<30x128xf32>, vector<8x128xf32> -> vector<8x128xf32>
    %c0_18 = arith.constant 0 : index
    %c384_19 = arith.constant 384 : index
    %26 = vector.load %arg3[%c0_18, %c384_19] : memref<1x768xf32, #tpu.memory_space<vmem>>, vector<1x128xf32>
    %27 = vector.broadcast %26 : vector<1x128xf32> to vector<8x128xf32>
    %28 = arith.addf %25, %27 : vector<8x128xf32>
    %cst_20 = arith.constant 0.000000e+00 : f32
    %29 = vector.broadcast %cst_20 : f32 to vector<8x128xf32>
    %30 = arith.maximumf %28, %29 : vector<8x128xf32>
    %31 = arith.maximumf %23, %30 : vector<8x128xf32>
    %c0_21 = arith.constant 0 : index
    %c512 = arith.constant 512 : index
    %32 = vector.load %arg2[%c0_21, %c512] : memref<30x768xf32, #tpu.memory_space<vmem>>, vector<30x128xf32>
    %cst_22 = arith.constant dense<0.000000e+00> : vector<8x128xf32>
    %33 = tpu.matmul %0, %32, %cst_22 {dimension_numbers = #tpu.dot_dimension_numbers<[1], [0], [0], [1], [0, 0, 1, 1], [], []>} : vector<8x30xf32>, vector<30x128xf32>, vector<8x128xf32> -> vector<8x128xf32>
    %c0_23 = arith.constant 0 : index
    %c512_24 = arith.constant 512 : index
    %34 = vector.load %arg3[%c0_23, %c512_24] : memref<1x768xf32, #tpu.memory_space<vmem>>, vector<1x128xf32>
    %35 = vector.broadcast %34 : vector<1x128xf32> to vector<8x128xf32>
    %36 = arith.addf %33, %35 : vector<8x128xf32>
    %cst_25 = arith.constant 0.000000e+00 : f32
    %37 = vector.broadcast %cst_25 : f32 to vector<8x128xf32>
    %38 = arith.maximumf %36, %37 : vector<8x128xf32>
    %39 = arith.maximumf %31, %38 : vector<8x128xf32>
    %c0_26 = arith.constant 0 : index
    %c640 = arith.constant 640 : index
    %40 = vector.load %arg2[%c0_26, %c640] : memref<30x768xf32, #tpu.memory_space<vmem>>, vector<30x128xf32>
    %cst_27 = arith.constant dense<0.000000e+00> : vector<8x128xf32>
    %41 = tpu.matmul %0, %40, %cst_27 {dimension_numbers = #tpu.dot_dimension_numbers<[1], [0], [0], [1], [0, 0, 1, 1], [], []>} : vector<8x30xf32>, vector<30x128xf32>, vector<8x128xf32> -> vector<8x128xf32>
    %c0_28 = arith.constant 0 : index
    %c640_29 = arith.constant 640 : index
    %42 = vector.load %arg3[%c0_28, %c640_29] : memref<1x768xf32, #tpu.memory_space<vmem>>, vector<1x128xf32>
    %43 = vector.broadcast %42 : vector<1x128xf32> to vector<8x128xf32>
    %44 = arith.addf %41, %43 : vector<8x128xf32>
    %cst_30 = arith.constant 0.000000e+00 : f32
    %45 = vector.broadcast %cst_30 : f32 to vector<8x128xf32>
    %46 = arith.maximumf %44, %45 : vector<8x128xf32>
    %47 = arith.maximumf %39, %46 : vector<8x128xf32>
    %c0_31 = arith.constant 0 : index
    %c0_32 = arith.constant 0 : index
    %48 = vector.load %arg4[%c0_31, %c0_32] : memref<128x256xf32, #tpu.memory_space<vmem>>, vector<128x256xf32>
    %cst_33 = arith.constant dense<0.000000e+00> : vector<8x256xf32>
    %49 = tpu.matmul %47, %48, %cst_33 {dimension_numbers = #tpu.dot_dimension_numbers<[1], [0], [0], [1], [0, 0, 1, 1], [], []>} : vector<8x128xf32>, vector<128x256xf32>, vector<8x256xf32> -> vector<8x256xf32>
    %c0_34 = arith.constant 0 : index
    %c0_35 = arith.constant 0 : index
    %50 = vector.load %arg5[%c0_34, %c0_35] : memref<1x256xf32, #tpu.memory_space<vmem>>, vector<1x256xf32>
    %51 = vector.broadcast %50 : vector<1x256xf32> to vector<8x256xf32>
    %52 = arith.addf %49, %51 : vector<8x256xf32>
    %cst_36 = arith.constant 0.000000e+00 : f32
    %53 = vector.broadcast %cst_36 : f32 to vector<8x256xf32>
    %54 = arith.maximumf %52, %53 : vector<8x256xf32>
    %55 = vector.extract_strided_slice %54 {offsets = [0, 0], sizes = [8, 64], strides = [1, 1]} : vector<8x256xf32> to vector<8x64xf32>
    %56 = vector.extract_strided_slice %54 {offsets = [0, 64], sizes = [8, 64], strides = [1, 1]} : vector<8x256xf32> to vector<8x64xf32>
    %57 = arith.maximumf %55, %56 : vector<8x64xf32>
    %58 = vector.extract_strided_slice %54 {offsets = [0, 128], sizes = [8, 64], strides = [1, 1]} : vector<8x256xf32> to vector<8x64xf32>
    %59 = vector.extract_strided_slice %54 {offsets = [0, 192], sizes = [8, 64], strides = [1, 1]} : vector<8x256xf32> to vector<8x64xf32>
    %60 = arith.maximumf %58, %59 : vector<8x64xf32>
    %61 = arith.maximumf %57, %60 : vector<8x64xf32>
    %c0_37 = arith.constant 0 : index
    %c0_38 = arith.constant 0 : index
    %62 = vector.load %arg6[%c0_37, %c0_38] : memref<64x128xf32, #tpu.memory_space<vmem>>, vector<64x128xf32>
    %cst_39 = arith.constant dense<0.000000e+00> : vector<8x128xf32>
    %63 = tpu.matmul %61, %62, %cst_39 {dimension_numbers = #tpu.dot_dimension_numbers<[1], [0], [0], [1], [0, 0, 1, 1], [], []>} : vector<8x64xf32>, vector<64x128xf32>, vector<8x128xf32> -> vector<8x128xf32>
    %c0_40 = arith.constant 0 : index
    %c0_41 = arith.constant 0 : index
    %64 = vector.load %arg7[%c0_40, %c0_41] : memref<1x128xf32, #tpu.memory_space<vmem>>, vector<1x128xf32>
    %65 = vector.broadcast %64 : vector<1x128xf32> to vector<8x128xf32>
    %66 = arith.addf %63, %65 : vector<8x128xf32>
    %cst_42 = arith.constant 0.000000e+00 : f32
    %67 = vector.broadcast %cst_42 : f32 to vector<8x128xf32>
    %68 = arith.maximumf %66, %67 : vector<8x128xf32>
    %c0_43 = arith.constant 0 : index
    %c0_44 = arith.constant 0 : index
    %69 = vector.load %arg8[%c0_43, %c0_44] : memref<128x256xf32, #tpu.memory_space<vmem>>, vector<128x256xf32>
    %cst_45 = arith.constant dense<0.000000e+00> : vector<8x256xf32>
    %70 = tpu.matmul %68, %69, %cst_45 {dimension_numbers = #tpu.dot_dimension_numbers<[1], [0], [0], [1], [0, 0, 1, 1], [], []>} : vector<8x128xf32>, vector<128x256xf32>, vector<8x256xf32> -> vector<8x256xf32>
    %c0_46 = arith.constant 0 : index
    %c0_47 = arith.constant 0 : index
    %71 = vector.load %arg9[%c0_46, %c0_47] : memref<1x256xf32, #tpu.memory_space<vmem>>, vector<1x256xf32>
    %72 = vector.broadcast %71 : vector<1x256xf32> to vector<8x256xf32>
    %73 = arith.addf %70, %72 : vector<8x256xf32>
    %cst_48 = arith.constant 0.000000e+00 : f32
    %74 = vector.broadcast %cst_48 : f32 to vector<8x256xf32>
    %75 = arith.maximumf %73, %74 : vector<8x256xf32>
    %c0_49 = arith.constant 0 : index
    %c0_50 = arith.constant 0 : index
    %76 = vector.load %arg10[%c0_49, %c0_50] : memref<256x8xf32, #tpu.memory_space<vmem>>, vector<256x8xf32>
    %cst_51 = arith.constant dense<0.000000e+00> : vector<8x8xf32>
    %77 = tpu.matmul %75, %76, %cst_51 {dimension_numbers = #tpu.dot_dimension_numbers<[1], [0], [0], [1], [0, 0, 1, 1], [], []>} : vector<8x256xf32>, vector<256x8xf32>, vector<8x8xf32> -> vector<8x8xf32>
    %c0_52 = arith.constant 0 : index
    %c0_53 = arith.constant 0 : index
    %78 = vector.load %arg11[%c0_52, %c0_53] : memref<1x8xf32, #tpu.memory_space<vmem>>, vector<1x8xf32>
    %79 = vector.broadcast %78 : vector<1x8xf32> to vector<8x8xf32>
    %80 = arith.addf %77, %79 : vector<8x8xf32>
    %81 = tpu.transpose %80, [1, 0] : vector<8x8xf32> -> vector<8x8xf32>
    %c0_54 = arith.constant 0 : index
    %c0_55 = arith.constant 0 : index
    %82 = vector.load %arg12[%c0_54, %c0_55] : memref<8x8xf32, #tpu.memory_space<vmem>>, vector<8x8xf32>
    tpu.vector_store %arg12[%c0_54, %c0_55], %81 {strides = array<i32>} : memref<8x8xf32, #tpu.memory_space<vmem>>, vector<8x8xf32>,
    return
  }
  func.func @transform_0(%arg0: i32) -> (i32, i32) {
    %c0_i32 = arith.constant 0 : i32
    %c0_i32_0 = arith.constant 0 : i32
    return %arg0, %c0_i32 : i32, i32
  }
  func.func @transform_1(%arg0: i32) -> (i32, i32) {
    %c0_i32 = arith.constant 0 : i32
    %c0_i32_0 = arith.constant 0 : i32
    %c0_i32_1 = arith.constant 0 : i32
    return %c0_i32, %c0_i32_0 : i32, i32
  }
  func.func @transform_2(%arg0: i32) -> (i32, i32) {
    %c0_i32 = arith.constant 0 : i32
    %c0_i32_0 = arith.constant 0 : i32
    %c0_i32_1 = arith.constant 0 : i32
    return %c0_i32, %c0_i32_0 : i32, i32
  }
  func.func @transform_3(%arg0: i32) -> (i32, i32) {
    %c0_i32 = arith.constant 0 : i32
    %c0_i32_0 = arith.constant 0 : i32
    %c0_i32_1 = arith.constant 0 : i32
    return %c0_i32, %c0_i32_0 : i32, i32
  }
  func.func @transform_4(%arg0: i32) -> (i32, i32) {
    %c0_i32 = arith.constant 0 : i32
    %c0_i32_0 = arith.constant 0 : i32
    %c0_i32_1 = arith.constant 0 : i32
    return %c0_i32, %c0_i32_0 : i32, i32
  }
  func.func @transform_5(%arg0: i32) -> (i32, i32) {
    %c0_i32 = arith.constant 0 : i32
    %c0_i32_0 = arith.constant 0 : i32
    %c0_i32_1 = arith.constant 0 : i32
    return %c0_i32, %c0_i32_0 : i32, i32
  }
  func.func @transform_6(%arg0: i32) -> (i32, i32) {
    %c0_i32 = arith.constant 0 : i32
    %c0_i32_0 = arith.constant 0 : i32
    %c0_i32_1 = arith.constant 0 : i32
    return %c0_i32, %c0_i32_0 : i32, i32
  }
  func.func @transform_7(%arg0: i32) -> (i32, i32) {
    %c0_i32 = arith.constant 0 : i32
    %c0_i32_0 = arith.constant 0 : i32
    %c0_i32_1 = arith.constant 0 : i32
    return %c0_i32, %c0_i32_0 : i32, i32
  }
  func.func @transform_8(%arg0: i32) -> (i32, i32) {
    %c0_i32 = arith.constant 0 : i32
    %c0_i32_0 = arith.constant 0 : i32
    %c0_i32_1 = arith.constant 0 : i32
    return %c0_i32, %c0_i32_0 : i32, i32
  }
  func.func @transform_9(%arg0: i32) -> (i32, i32) {
    %c0_i32 = arith.constant 0 : i32
    %c0_i32_0 = arith.constant 0 : i32
    %c0_i32_1 = arith.constant 0 : i32
    return %c0_i32, %c0_i32_0 : i32, i32
  }
  func.func @transform_10(%arg0: i32) -> (i32, i32) {
    %c0_i32 = arith.constant 0 : i32
    %c0_i32_0 = arith.constant 0 : i32
    %c0_i32_1 = arith.constant 0 : i32
    return %c0_i32, %c0_i32_0 : i32, i32
  }
  func.func @transform_11(%arg0: i32) -> (i32, i32) {
    %c0_i32 = arith.constant 0 : i32
    %c0_i32_0 = arith.constant 0 : i32
    return %c0_i32, %arg0 : i32, i32
  }
}

</mosaic_0001>

<bundles_post_ra>
// kernel: tpu_custom_call.1
= control target key start
LH: loop header
LB: loop body
LE: loop exit
PB: predicated region body
PF: predicated region fallthrough
CT: control target
= control target key end

     0   :  { %16 = vsyncpa [#allocation3], 0  ;;  %s1834_s0 = inlined_call_operand.vmem [shape: f32[8,30], index: 0, kind: input, shape index: {}]   ;;  %s1835_s1 = inlined_call_operand.hbm [shape: f32[30,768], index: 1, kind: input, shape index: {}]   ;;  %s1836_s2 = inlined_call_operand.vmem [shape: f32[1,768], index: 2, kind: input, shape index: {}]   ;;  %s1837_s3 = inlined_call_operand.vmem [shape: f32[128,256], index: 3, kind: input, shape index: {}]   ;;  %s1838_s4 = inlined_call_operand.vmem [shape: f32[1,256], index: 4, kind: input, shape index: {}]   ;;  %s1839_s5 = inlined_call_operand.hbm [shape: f32[64,128], index: 5, kind: input, shape index: {}]   ;;  %s1840_s6 = inlined_call_operand.hbm [shape: f32[1,128], index: 6, kind: input, shape index: {}]   ;;  %s1841_s7 = inlined_call_operand.hbm [shape: f32[128,256], index: 7, kind: input, shape index: {}]   ;;  %s1842_s8 = inlined_call_operand.hbm [shape: f32[1,256], index: 8, kind: input, shape index: {}]   ;;  %s1843_s9 = inlined_call_operand.vmem [shape: f32[256,8], index: 9, kind: input, shape index: {}]   ;;  %s1844_s10 = inlined_call_operand.vmem [shape: f32[1,8], index: 10, kind: input, shape index: {}]   ;;  %s1845_s11 = inlined_call_operand.hbm [shape: f32[8,8], index: 11, kind: output, shape index: {}]  }
   0x1   :  { %17 = vsyncpa [#allocation6], 0 }
   0x2   :  { %18 = vsyncpa [#allocation9], 0 }
   0x3   :  { %19 = vsyncpa [#allocation4], 0  ;;  %s1442_s17 = smov [#allocation5]  }
   0x4   :  { %s45_s18 = sshll.u32 %s1442_s17, 4  ;;  %s46_s18 = int_to_ptr.vmem [resolvable:$true] %s45_s18 }
   0x5   :  { %s1322_s19 = scalar_lea.vmem %s46_s18, 1024  ;;  %p1327_p1 = scmp.lt.s32.totalorder %s46_s18, %s46_s18 }
   0x6   :  { %p1323_p0 = scmp.ne.s32.totalorder %s46_s18, %s1322_s19  ;;  %p1328_p2 = scmp.lt.s32.totalorder %s1322_s19, %s1322_s19 }
   0x8   :  { %p1329_p3 = por %p1328_p2, %p1327_p1 }
   0xa   :  { %p1330_p4 = pnand %p1329_p3, %p1323_p0 }
   0xc   :  { %1333 = shalt.err (!%p1330_p4)
}
   0xd   :  { %s1443_s20 = smov 128   ;;  %s1444_s21 = smov 8  }
   0xe   :  { %51 = dma.hbm_to_vmem [thread:$0]  %s1839_s5, 1024, %s46_s18, [#allocation6], %s1443_s20, %s1443_s20, %s1444_s21  }
   0xf   :  { %s1445_s24 = smov [#allocation8]  }
  0x10   :  { %s67_s25 = sshll.u32 %s1445_s24, 4  ;;  %s68_s25 = int_to_ptr.vmem [resolvable:$true] %s67_s25 }
  0x11   :  { %s1342_s26 = scalar_lea.vmem %s68_s25, 4096  ;;  %p1347_p6 = scmp.lt.s32.totalorder %s68_s25, %s68_s25 }
  0x12   :  { %p1343_p5 = scmp.ne.s32.totalorder %s68_s25, %s1342_s26  ;;  %p1348_p7 = scmp.lt.s32.totalorder %s1342_s26, %s1342_s26 }
  0x14   :  { %p1349_p8 = por %p1348_p7, %p1347_p6 }
  0x16   :  { %p1350_p9 = pnand %p1349_p8, %p1343_p5 }
  0x18   :  { %1353 = shalt.err (!%p1350_p9)
}
  0x19   :  { %s1446_s27 = smov 256   ;;  %s1447_s28 = smov 16  }
  0x1a   :  { %73 = dma.hbm_to_vmem [thread:$0]  %s1841_s7, 4096, %s68_s25, [#allocation9], %s1446_s27, %s1446_s27, %s1447_s28  }
  0x1b   :  { %s1448_s12 = smov [#allocation2]  }
  0x1c   :  { %s27_s13 = sshll.u32 %s1448_s12, 4  ;;  %s28_s13 = int_to_ptr.vmem [resolvable:$true] %s27_s13 }
  0x1d   :  { %s1362_s5 = scalar_lea.vmem %s28_s13, 3072  ;;  %p1367_p11 = scmp.lt.s32.totalorder %s28_s13, %s28_s13 }
  0x1e   :  { %p1363_p10 = scmp.ne.s32.totalorder %s28_s13, %s1362_s5  ;;  %p1368_p12 = scmp.lt.s32.totalorder %s1362_s5, %s1362_s5 }
  0x20   :  { %p1369_p13 = por %p1368_p12, %p1367_p11 }
  0x22   :  { %p1370_p0 = pnand %p1369_p13, %p1363_p10 }
  0x24   :  { %1373 = shalt.err (!%p1370_p0)
}
  0x25   :  { %s1449_s14 = smov 768   ;;  %s1450_s15 = smov 48  }
  0x26   :  { %33 = dma.hbm_to_vmem [thread:$0]  %s1835_s1, 3072, %s28_s13, [#allocation3], %s1449_s14, %s1449_s14, %s1450_s15  }
  0x27   :  { %s1451_s18 = smov [#allocation7]   ;;  %s1452_s7 = smov [#allocation10]  }
  0x28   :  { %s58_s19 = sshll.u32 %s1451_s18, 4  ;;  %s80_s20 = sshll.u32 %s1452_s7, 4  ;;  %s59_s19 = int_to_ptr.vmem [resolvable:$true] %s58_s19  ;;  %s81_s20 = int_to_ptr.vmem [resolvable:$true] %s80_s20 }
  0x29   :  { %s1382_s21 = scalar_lea.vmem %s59_s19, 16  ;;  %s1386_s22 = scalar_lea.vmem %s59_s19, 32 }
  0x2a   :  { %p1383_p1 = scmp.ne.s32.totalorder %s59_s19, %s1382_s21  ;;  %p1387_p2 = scmp.lt.s32.totalorder %s59_s19, %s59_s19 }
  0x2b   :  { %p1388_p3 = scmp.lt.s32.totalorder %s1386_s22, %s1382_s21 }
  0x2d   :  { %p1389_p4 = por %p1388_p3, %p1387_p2 }
  0x2f   :  { %p1390_p5 = pnand %p1389_p4, %p1383_p1 }
  0x31   :  { %1393 = shalt.err (!%p1390_p5)
}
  0x32   :  { %61 = dma.hbm_to_vmem [thread:$0]  %s1840_s6, 16, %s59_s19, [#allocation6]  }
  0x33   :  { %s1402_s25 = scalar_lea.vmem %s81_s20, 32  ;;  %p1407_p7 = scmp.lt.s32.totalorder %s81_s20, %s81_s20 }
  0x34   :  { %p1403_p6 = scmp.ne.s32.totalorder %s81_s20, %s1402_s25  ;;  %p1408_p8 = scmp.lt.s32.totalorder %s1402_s25, %s1402_s25 }
  0x36   :  { %p1409_p9 = por %p1408_p8, %p1407_p7 }
  0x38   :  { %p1410_p10 = pnand %p1409_p9, %p1403_p6 }
  0x3a   :  { %1413 = shalt.err (!%p1410_p10)
}
  0x3b   :  { %83 = dma.hbm_to_vmem [thread:$0]  %s1842_s8, 32, %s81_s20, [#allocation9]  }
  0x3c   :  { %1434 = dma.done.wait [#allocation3], 3072  }
  0x3d   :  { %1435 = vsyncadd [#allocation3], 4294964224 }
  0x3e   :  { %1436 = dma.done.wait [#allocation6], 1040  }
  0x3f   :  { %1437 = vsyncadd [#allocation6], 4294966256 }
  0x40   :  { %1438 = dma.done.wait [#allocation9], 4128  }
  0x41   :  { %1439 = vsyncadd [#allocation9], 4294963168  ;;  %v1453_v0 = vmov 0.0   ;;  %vm1454_vm0 = vmmov 0   ;;  %vm119_vm1 = vcmask 1045504   ;;  %v106_v2 = vld [vmem:[#allocation2 + $0x60] sm:$0xff] }
  0x42   :  { %1214 = vmatprep.subr.mxu1 %v1453_v0  ;;  %1222 = vmatprep.mubr.msk.f32.mxu1 %vm1454_vm0, %v1453_v0  ;;  %v107_v1 = vld [vmem:[#allocation2 + $0x90] sm:$0x3f]  ;;  %v283_v4 = vld [vmem:[#allocation2 + $0xa0] sm:$0x3f]  ;;  %vm115_vm2 = vcmask 244736   ;;  %v196_v10 = vld [vmem:[#allocation2 + $0x68] sm:$0xff] }
  0x43   :  { %1236 = vmatprep.subr.mxu0 %v1453_v0  ;;  %1244 = vmatprep.mubr.msk.f32.mxu0 %vm1454_vm0, %v1453_v0  ;;  %v105_v3 = vld [vmem:[#allocation2 + $0x30] sm:$0xff]  ;;  %v104_v6 = vld [vmem:[#allocation2] sm:$0xff]  ;;  %v197_v9 = vld [vmem:[#allocation2 + $0x98] sm:$0x3f]  ;;  %vm767_vm3 = vcmask 523264   ;;  %s1456_s16 = smov [#allocation11]  }
  0x44   :  { %1215 = vmatpush3.msk.msra.mxu1 %vm119_vm1, %v107_v1  ;;  %1237 = vmatpush3.msk.msra.mxu0 %vm119_vm1, %v283_v4  ;;  %v282_v5 = vld [vmem:[#allocation2 + $0x70] sm:$0xff]  ;;  %v281_v7 = vld [vmem:[#allocation2 + $0x40] sm:$0xff]  ;;  %v195_v12 = vld [vmem:[#allocation2 + $0x38] sm:$0xff]  ;;  %s1108_s17 = sshll.u32 %s1456_s16, 4  ;;  %vm1100_vm4 = vcmask 64512   ;;  %s1109_s17 = int_to_ptr.vmem [resolvable:$true] %s1108_s17 }
  0x45   :  { %1216 = vmatprep.subr.mxu1 %v1453_v0  ;;  %1238 = vmatprep.subr.mxu0 %v1453_v0  ;;  %v1546_v8 = vld [vmem:[%s1834_s0] sm:$0xff]  ;;  %v280_v11 = vld [vmem:[#allocation2 + $0x10] sm:$0xff]  ;;  %v194_v14 = vld [vmem:[#allocation2 + $0x8] sm:$0xff]  ;;  %s1414_s18 = scalar_lea.vmem %s1109_s17, 128  ;;  %p1419_p12 = scmp.lt.s32.totalorder %s1109_s17, %s1109_s17 }
  0x46   :  { %1217 = vmatpush3.msra.mxu1 %v106_v2  ;;  %1239 = vmatpush3.msra.mxu0 %v282_v5  ;;  %v455_v13 = vld [vmem:[#allocation2 + $0xb0] sm:$0x3f]  ;;  %v369_v15 = vld [vmem:[#allocation2 + $0xa8] sm:$0x3f]  ;;  %v454_v16 = vld [vmem:[#allocation2 + $0x80] sm:$0xff]  ;;  %p1415_p11 = scmp.ne.s32.totalorder %s1109_s17, %s1414_s18  ;;  %p1420_p13 = scmp.lt.s32.totalorder %s1414_s18, %s1414_s18 }
  0x47   :  { %1218 = vmatprep.subr.mxu1 %v1453_v0  ;;  %1240 = vmatprep.subr.mxu0 %v1453_v0  ;;  %v368_v17 = vld [vmem:[#allocation2 + $0x78] sm:$0xff]  ;;  %v453_v18 = vld [vmem:[#allocation2 + $0x50] sm:$0xff]  ;;  %v367_v19 = vld [vmem:[#allocation2 + $0x48] sm:$0xff] }
  0x48   :  { %1219 = vmatpush3.msra.mxu1 %v105_v3  ;;  %1241 = vmatpush3.msra.mxu0 %v281_v7  ;;  %v452_v20 = vld [vmem:[#allocation2 + $0x20] sm:$0xff]  ;;  %v366_v21 = vld [vmem:[#allocation2 + $0x18] sm:$0xff]  ;;  %v540_v23 = vld [vmem:[#allocation2 + $0x88] sm:$0xff]  ;;  %p1421_p0 = por %p1420_p13, %p1419_p12 }
  0x49   :  { %1220 = vmatprep.subr.mxu1 %v1453_v0  ;;  %1242 = vmatprep.subr.mxu0 %v1453_v0  ;;  %v541_v22 = vld [vmem:[#allocation2 + $0xb8] sm:$0x3f]  ;;  %v538_v26 = vld [vmem:[#allocation2 + $0x28] sm:$0xff]  ;;  %v654_v27 = vld [vmem:[%s1837_s3 + $0xf0] sm:$0xff] }
  0x4a   :  { %1221 = vmatpush3.msra.mxu1 %v104_v6  ;;  %1243 = vmatpush3.msra.mxu0 %v280_v11  ;;  %v655_v24 = vld [vmem:[%s1837_s3 + $0xf8] sm:$0xff]  ;;  %v653_v28 = vld [vmem:[%s1837_s3 + $0xe8] sm:$0xff]  ;;  %v652_v29 = vld [vmem:[%s1837_s3 + $0xe0] sm:$0xff]  ;;  %p1422_p1 = pnand %p1421_p0, %p1415_p11 }
  0x4b   :  { %1223 = vmatmul.mubr.msk.f32.vlgmr.msra.gmra.mxu1 %vm115_vm2, %v1546_v8  ;;  %1225 = vmatprep.subr.mxu1 %v1453_v0  ;;  %v539_v25 = vld [vmem:[#allocation2 + $0x58] sm:$0xff]  ;;  %v650_v31 = vld [vmem:[%s1837_s3 + $0xd0] sm:$0xff]  ;;  %v649_v32 = vld [vmem:[%s1837_s3 + $0xc8] sm:$0xff] }
  0x4c   :  { %1226 = vmatpush3.msk.msra.mxu1 %vm119_vm1, %v197_v9  ;;  %1233 = vmatprep.mubr.msk.f32.mxu1 %vm1454_vm0, %v1453_v0  ;;  %v651_v30 = vld [vmem:[%s1837_s3 + $0xd8] sm:$0xff]  ;;  %v648_v33 = vld [vmem:[%s1837_s3 + $0xc0] sm:$0xff]  ;;  %v646_v35 = vld [vmem:[%s1837_s3 + $0xb0] sm:$0xff] }
  0x4d   :  { %1227 = vmatprep.subr.mxu1 %v1453_v0  ;;  %1245 = vmatmul.mubr.msk.f32.vlgmr.msra.gmra.mxu0 %vm115_vm2, %v1546_v8  ;;  %v647_v34 = vld [vmem:[%s1837_s3 + $0xb8] sm:$0xff]  ;;  %v645_v36 = vld [vmem:[%s1837_s3 + $0xa8] sm:$0xff]  ;;  %v644_v37 = vld [vmem:[%s1837_s3 + $0xa0] sm:$0xff] }
  0x4e   :  { %1228 = vmatpush3.msra.mxu1 %v196_v10  ;;  %1258 = vmatprep.subr.mxu0 %v1453_v0  ;;  %v643_v38 = vld [vmem:[%s1837_s3 + $0x98] sm:$0xff]  ;;  %v642_v39 = vld [vmem:[%s1837_s3 + $0x90] sm:$0xff]  ;;  %v641_v40 = vld [vmem:[%s1837_s3 + $0x88] sm:$0xff] }
  0x4f   :  { %1229 = vmatprep.subr.mxu1 %v1453_v0  ;;  %1259 = vmatpush3.msk.msra.mxu0 %vm119_vm1, %v455_v13  ;;  %v640_v41 = vld [vmem:[%s1837_s3 + $0x80] sm:$0xff]  ;;  %v639_v42 = vld [vmem:[%s1837_s3 + $0x78] sm:$0xff]  ;;  %v638_v43 = vld [vmem:[%s1837_s3 + $0x70] sm:$0xff] }
  0x50   :  { %1230 = vmatpush3.msra.mxu1 %v195_v12  ;;  %1260 = vmatprep.subr.mxu0 %v1453_v0  ;;  %v637_v44 = vld [vmem:[%s1837_s3 + $0x68] sm:$0xff]  ;;  %v636_v45 = vld [vmem:[%s1837_s3 + $0x60] sm:$0xff]  ;;  %v635_v46 = vld [vmem:[%s1837_s3 + $0x58] sm:$0xff] }
  0x51   :  { %1231 = vmatprep.subr.mxu1 %v1453_v0  ;;  %1261 = vmatpush3.msra.mxu0 %v454_v16  ;;  %v634_v47 = vld [vmem:[%s1837_s3 + $0x50] sm:$0xff]  ;;  %v633_v48 = vld [vmem:[%s1837_s3 + $0x48] sm:$0xff]  ;;  %v632_v49 = vld [vmem:[%s1837_s3 + $0x40] sm:$0xff] }
  0x52   :  { %1232 = vmatpush3.msra.mxu1 %v194_v14  ;;  %1262 = vmatprep.subr.mxu0 %v1453_v0  ;;  %v631_v50 = vld [vmem:[%s1837_s3 + $0x38] sm:$0xff]  ;;  %v630_v51 = vld [vmem:[%s1837_s3 + $0x30] sm:$0xff]  ;;  %v629_v52 = vld [vmem:[%s1837_s3 + $0x28] sm:$0xff] }
  0x53   :  { %1234 = vmatmul.mubr.msk.f32.vlgmr.msra.gmra.mxu1 %vm115_vm2, %v1546_v8  ;;  %1247 = vmatprep.subr.mxu1 %v1453_v0  ;;  %v628_v53 = vld [vmem:[%s1837_s3 + $0x20] sm:$0xff]  ;;  %v627_v54 = vld [vmem:[%s1837_s3 + $0x18] sm:$0xff]  ;;  %v626_v55 = vld [vmem:[%s1837_s3 + $0x10] sm:$0xff] }
  0x54   :  { %1248 = vmatpush3.msk.msra.mxu1 %vm119_vm1, %v369_v15  ;;  %1255 = vmatprep.mubr.msk.f32.mxu1 %vm1454_vm0, %v1453_v0  ;;  %v625_v56 = vld [vmem:[%s1837_s3 + $0x8] sm:$0xff]  ;;  %v624_v57 = vld [vmem:[%s1837_s3] sm:$0xff] }
  0x55   :  { %1249 = vmatprep.subr.mxu1 %v1453_v0  ;;  %1263 = vmatpush3.msra.mxu0 %v453_v18  ;;  %v1122_v61 = vld [vmem:[%s1836_s2 + $0x1] ss:$0 sm:$0xff]  ;;  %v1119_v63 = vld [vmem:[%s1836_s2] ss:$0 sm:$0xff]  ;;  %v1125_v4 = vld [vmem:[%s1836_s2 + $0x2] ss:$0 sm:$0xff] }
  0x56   :  { %1250 = vmatpush3.msra.mxu1 %v368_v17  ;;  %1264 = vmatprep.subr.mxu0 %v1453_v0  ;;  %v1131_v11 = vld [vmem:[%s1836_s2 + $0x4] ss:$0 sm:$0xff] }
  0x57   :  { %1251 = vmatprep.subr.mxu1 %v1453_v0  ;;  %1265 = vmatpush3.msra.mxu0 %v452_v20 }
  0x58   :  { %1252 = vmatpush3.msra.mxu1 %v367_v19  ;;  %1266 = vmatprep.mubr.msk.f32.mxu0 %vm1454_vm0, %v1453_v0 }
  0x59   :  { %1253 = vmatprep.subr.mxu1 %v1453_v0  ;;  %1267 = vmatmul.mubr.msk.f32.vlgmr.msra.gmra.mxu0 %vm115_vm2, %v1546_v8 }
  0x5a   :  { %1254 = vmatpush3.msra.mxu1 %v366_v21  ;;  %668 = vmatprep.subr.mxu0 %v655_v24  ;;  %v1134_v21 = vld [vmem:[%s1836_s2 + $0x5] ss:$0 sm:$0xff] }
  0x5b   :  { %1256 = vmatmul.mubr.msk.f32.vlgmr.msra.gmra.mxu1 %vm115_vm2, %v1546_v8  ;;  %1269 = vmatprep.subr.mxu1 %v1453_v0 }
  0x5c   :  { %1270 = vmatpush3.msk.msra.mxu1 %vm119_vm1, %v541_v22  ;;  %1277 = vmatprep.mubr.msk.f32.mxu1 %vm1454_vm0, %v1453_v0 }
  0x5d   :  { %1271 = vmatprep.subr.mxu1 %v1453_v0  ;;  %732 = vmatprep.mubr.f32.mxu0 %v1453_v0 }
  0x5e   :  { %1272 = vmatpush3.msra.mxu1 %v540_v23  ;;  %669 = vmatpush1.msra.mxu0 %v654_v27 }
  0x5f   :  { %1273 = vmatprep.subr.mxu1 %v1453_v0  ;;  %670 = vmatprep.subr.mxu0 %v653_v28 }
  0x60   :  { %1274 = vmatpush3.msra.mxu1 %v539_v25  ;;  %671 = vmatpush1.msra.mxu0 %v652_v29 }
  0x61   :  { %1275 = vmatprep.subr.mxu1 %v1453_v0  ;;  %672 = vmatprep.subr.mxu0 %v651_v30  ;;  %v759_v30 = vld [vmem:[#allocation5 + $0x38] sm:$0xff] }
  0x62   :  { %1276 = vmatpush3.msra.mxu1 %v538_v26  ;;  %673 = vmatpush1.msra.mxu0 %v650_v31  ;;  %v758_v31 = vld [vmem:[#allocation5 + $0x30] sm:$0xff] }
  0x63   :  { %1278 = vmatmul.mubr.msk.f32.vlgmr.msra.gmra.mxu1 %vm115_vm2, %v1546_v8  ;;  %1280 = vmatprep.subr.mxu1 %v1453_v0  ;;  %v1128_v8 = vld [vmem:[%s1836_s2 + $0x3] ss:$0 sm:$0xff] }
  0x64   :  { %1296 = vmatprep.mubr.msk.f32.mxu1 %vm1454_vm0, %v1453_v0  ;;  %674 = vmatprep.subr.mxu0 %v649_v32  ;;  %v757_v32 = vld [vmem:[#allocation5 + $0x28] sm:$0xff] }
  0x65   :  { %675 = vmatpush1.msra.mxu0 %v648_v33  ;;  %1281 = vmatpush3.msra.mxu1 %v759_v30  ;;  %v756_v33 = vld [vmem:[#allocation5 + $0x20] sm:$0xff] }
  0x66   :  { %676 = vmatprep.subr.mxu0 %v647_v34  ;;  %1282 = vmatprep.subr.mxu1 %v1453_v0  ;;  %v658_v34 = vlaneseq  ;;  %v987_v30 = vld [vmem:[%s1843_s9 + $0xe0] sm:$0xff] }
  0x67   :  { %677 = vmatpush1.msra.mxu0 %v646_v35  ;;  %1283 = vmatpush3.msra.mxu1 %v758_v31  ;;  %v971_v31 = vld [vmem:[%s1843_s9 + $0x60] sm:$0xff] }
  0x68   :  { %678 = vmatprep.subr.mxu0 %v645_v36  ;;  %1284 = vmatprep.subr.mxu1 %v1453_v0  ;;  %v1713_v35 = vshrl.u32 %v658_v34, 7  ;;  %v755_v36 = vld [vmem:[#allocation5 + $0x18] sm:$0xff]  ;;  %v985_v34 = vld [vmem:[%s1843_s9 + $0xd0] sm:$0xff] }
  0x69   :  { %679 = vmatpush1.msra.mxu0 %v644_v37  ;;  %1285 = vmatpush3.msra.mxu1 %v757_v32  ;;  %v754_v37 = vld [vmem:[#allocation5 + $0x10] sm:$0xff]  ;;  %v986_v32 = vld [vmem:[%s1843_s9 + $0xd8] sm:$0xff] }
  0x6a   :  { %680 = vmatprep.subr.mxu0 %v643_v38  ;;  %1286 = vmatprep.subr.mxu1 %v1453_v0  ;;  %v660_v38 = vsub.s32 0, %v1713_v35 }
  0x6b   :  { %681 = vmatpush1.msra.mxu0 %v642_v39  ;;  %1287 = vmatpush3.msra.mxu1 %v756_v33  ;;  %v656_v39 = vld [vmem:[%s1838_s4] sm:$0x3]  ;;  %s1455_s4 = smov 64   ;;  %v970_v33 = vld [vmem:[%s1843_s9 + $0x58] sm:$0xff] }
  0x6c   :  { %682 = vmatprep.subr.mxu0 %v641_v40  ;;  %1288 = vmatprep.subr.mxu1 %v1453_v0  ;;  %v664_v40 = vsub.s32 1, %v1713_v35 }
  0x6d   :  { %683 = vmatpush1.msra.mxu0 %v640_v41  ;;  %1289 = vmatpush3.msra.mxu1 %v755_v36  ;;  %v753_v41 = vld [vmem:[#allocation5 + $0x8] sm:$0xff]  ;;  %v969_v36 = vld [vmem:[%s1843_s9 + $0x50] sm:$0xff] }
  0x6e   :  { %684 = vmatprep.subr.mxu0 %v639_v42  ;;  %1290 = vmatprep.subr.mxu1 %v1453_v0  ;;  %v661_v42 = vrot.slane %v656_v39, %v660_v38 }
  0x6f   :  { %685 = vmatpush1.msra.mxu0 %v638_v43  ;;  %1291 = vmatpush3.msra.mxu1 %v754_v37  ;;  %v752_v43 = vld [vmem:[#allocation5] sm:$0xff]  ;;  %v984_v37 = vld [vmem:[%s1843_s9 + $0xc8] sm:$0xff] }
  0x70   :  { %686 = vmatprep.subr.mxu0 %v637_v44  ;;  %1292 = vmatprep.subr.mxu1 %v1453_v0  ;;  %v665_v44 = vrot.slane %v656_v39, %v664_v40  ;;  %v968_v39 = vld [vmem:[%s1843_s9 + $0x48] sm:$0xff] }
  0x71   :  { %687 = vmatpush1.msra.mxu0 %v636_v45  ;;  %1293 = vmatpush3.msra.mxu1 %v753_v41  ;;  %v983_v41 = vld [vmem:[%s1843_s9 + $0xc0] sm:$0xff] }
  0x72   :  { %688 = vmatprep.subr.mxu0 %v635_v46  ;;  %1294 = vmatprep.subr.mxu1 %v1453_v0  ;;  %v873_v46 = vld [vmem:[#allocation8 + $0xf8] sm:$0xff] }
  0x73   :  { %689 = vmatpush1.msra.mxu0 %v634_v47  ;;  %1295 = vmatpush3.msra.mxu1 %v752_v43  ;;  %v982_v43 = vld [vmem:[%s1843_s9 + $0xb8] sm:$0xff] }
  0x74   :  { %690 = vmatprep.subr.mxu0 %v633_v48  ;;  %886 = vmatprep.subr.mxu1 %v873_v46  ;;  %v965_v46 = vld [vmem:[%s1843_s9 + $0x30] sm:$0xff] }
  0x75   :  { %691 = vmatpush1.msra.mxu0 %v632_v49 }
  0x76   :  { %692 = vmatprep.subr.mxu0 %v631_v50 }
  0x77   :  { %693 = vmatpush1.msra.mxu0 %v630_v51 }
  0x78   :  { %694 = vmatprep.subr.mxu0 %v629_v52 }
  0x79   :  { %695 = vmatpush1.msra.mxu0 %v628_v53 }
  0x7a   :  { %696 = vmatprep.subr.mxu0 %v627_v54 }
  0x7b   :  { %697 = vmatpush1.msra.mxu0 %v626_v55 }
  0x7c   :  { %698 = vmatprep.subr.mxu0 %v625_v56 }
  0x7d   :  { %699 = vmatpush1.msra.mxu0 %v624_v57  ;;  %v872_v57 = vld [vmem:[#allocation8 + $0xf0] sm:$0xff] }
 0x10b   :  { %v189_v58 = vpop.f32.mrf.mxu1 }
 0x10c   :  { %v190_v5 = vadd.f32 %v1119_v63, %v189_v58  ;;  %v871_v58 = vld [vmem:[#allocation8 + $0xe8] sm:$0xff]  ;;  %v866_v63 = vld [vmem:[#allocation8 + $0xc0] sm:$0xff] }
 0x10d   :  { %v1224_v59 = vpop.f32.mrf.mxu1  ;;  %v360_v60 = vpop.f32.mrf.mxu0 }
 0x10e   :  { %v361_v7 = vadd.f32 %v1125_v4, %v360_v60  ;;  %v193_v9 = vmax.f32 %v190_v5, 0.0  ;;  %v870_v59 = vld [vmem:[#allocation8 + $0xe0] sm:$0xff]  ;;  %v869_v60 = vld [vmem:[#allocation8 + $0xd8] sm:$0xff] }
 0x10f   :  { %v1246_v62 = vpop.f32.mrf.mxu0  ;;  %v862_v4 = vld [vmem:[#allocation8 + $0xa0] sm:$0xff]  ;;  %v861_v5 = vld [vmem:[#allocation8 + $0x98] sm:$0xff] }
 0x110   :  { %v364_v13 = vmax.f32 %v361_v7, 0.0  ;;  %v867_v62 = vld [vmem:[#allocation8 + $0xc8] sm:$0xff]  ;;  %v858_v7 = vld [vmem:[#allocation8 + $0x80] sm:$0xff] }
 0x113   :  { %v274_v1 = vpop.f32.mrf.mxu1 }
 0x114   :  { %v275_v2 = vadd.f32 %v1122_v61, %v274_v1  ;;  %v868_v61 = vld [vmem:[#allocation8 + $0xd0] sm:$0xff]  ;;  %v865_v1 = vld [vmem:[#allocation8 + $0xb8] sm:$0xff] }
 0x115   :  { %v1235_v3 = vpop.f32.mrf.mxu1 }
 0x116   :  { %v278_v6 = vmax.f32 %v275_v2, 0.0  ;;  %v864_v2 = vld [vmem:[#allocation8 + $0xb0] sm:$0xff]  ;;  %v863_v3 = vld [vmem:[#allocation8 + $0xa8] sm:$0xff] }
 0x118   :  { %v279_v12 = vmax.f32 %v193_v9, %v278_v6  ;;  %v860_v6 = vld [vmem:[#allocation8 + $0x90] sm:$0xff] }
 0x119   :  { %v532_v15 = vpop.f32.mrf.mxu0  ;;  %v856_v9 = vld [vmem:[#allocation8 + $0x70] sm:$0xff] }
 0x11a   :  { %v533_v18 = vadd.f32 %v1131_v11, %v532_v15  ;;  %v365_v20 = vmax.f32 %v279_v12, %v364_v13  ;;  %v854_v11 = vld [vmem:[#allocation8 + $0x60] sm:$0xff]  ;;  %v853_v12 = vld [vmem:[#allocation8 + $0x58] sm:$0xff]  ;;  %v852_v13 = vld [vmem:[#allocation8 + $0x50] sm:$0xff] }
 0x11b   :  { %v446_v10 = vpop.f32.mrf.mxu1  ;;  %v1268_v19 = vpop.f32.mrf.mxu0  ;;  %v850_v15 = vld [vmem:[#allocation8 + $0x40] sm:$0xff] }
 0x11c   :  { %v447_v14 = vadd.f32 %v1128_v8, %v446_v10  ;;  %v536_v23 = vmax.f32 %v533_v18, 0.0  ;;  %v857_v8 = vld [vmem:[#allocation8 + $0x78] sm:$0xff]  ;;  %v855_v10 = vld [vmem:[#allocation8 + $0x68] sm:$0xff]  ;;  %v846_v19 = vld [vmem:[#allocation8 + $0x20] sm:$0xff] }
 0x11d   :  { %v1257_v16 = vpop.f32.mrf.mxu1  ;;  %v847_v18 = vld [vmem:[#allocation8 + $0x28] sm:$0xff] }
 0x11e   :  { %v450_v17 = vmax.f32 %v447_v14, 0.0  ;;  %v851_v14 = vld [vmem:[#allocation8 + $0x48] sm:$0xff]  ;;  %v849_v16 = vld [vmem:[#allocation8 + $0x38] sm:$0xff] }
 0x120   :  { %v451_v22 = vmax.f32 %v365_v20, %v450_v17  ;;  %v848_v17 = vld [vmem:[#allocation8 + $0x30] sm:$0xff]  ;;  %v845_v20 = vld [vmem:[#allocation8 + $0x18] sm:$0xff] }
 0x122   :  { %v537_v27 = vmax.f32 %v451_v22, %v536_v23  ;;  %v843_v22 = vld [vmem:[#allocation8 + $0x8] sm:$0xff]  ;;  %v842_v23 = vld [vmem:[#allocation8] sm:$0xff] }
 0x123   :  { %v618_v24 = vpop.f32.mrf.mxu1 }
 0x124   :  { %v619_v25 = vadd.f32 %v1134_v21, %v618_v24  ;;  %v844_v21 = vld [vmem:[#allocation8 + $0x10] sm:$0xff] }
 0x125   :  { %v1279_v26 = vpop.f32.mrf.mxu1  ;;  %v990_v24 = vld [vmem:[%s1843_s9 + $0xf8] sm:$0xff] }
 0x126   :  { %v622_v28 = vmax.f32 %v619_v25, 0.0  ;;  %v974_v25 = vld [vmem:[%s1843_s9 + $0x78] sm:$0xff]  ;;  %v989_v26 = vld [vmem:[%s1843_s9 + $0xf0] sm:$0xff]  ;;  %1179 = vmatprep.subr.mxu0 %v990_v24 }
 0x128   :  { %v623_v29 = vmax.f32 %v537_v27, %v622_v28  ;;  %v973_v27 = vld [vmem:[%s1843_s9 + $0x70] sm:$0xff]  ;;  %v988_v28 = vld [vmem:[%s1843_s9 + $0xe8] sm:$0xff] }
 0x12a   :  { %733 = vmatmul.mubr.f32.vlgmr.msra.gmra.mxu0 %v623_v29  ;;  %v972_v29 = vld [vmem:[%s1843_s9 + $0x68] sm:$0xff] }
 0x12b   :  { %1180 = vmatpush3.msra.mxu0 %v974_v25 }
 0x12c   :  { %1181 = vmatprep.subr.mxu0 %v989_v26 }
 0x12d   :  { %1182 = vmatpush3.msra.mxu0 %v973_v27 }
 0x12e   :  { %1183 = vmatprep.subr.mxu0 %v988_v28 }
 0x12f   :  { %1184 = vmatpush3.msra.mxu0 %v972_v29 }
 0x130   :  { %1185 = vmatprep.subr.mxu0 %v987_v30 }
 0x131   :  { %1186 = vmatpush3.msra.mxu0 %v971_v31 }
 0x132   :  { %1187 = vmatprep.subr.mxu0 %v986_v32 }
 0x133   :  { %1188 = vmatpush3.msra.mxu0 %v970_v33 }
 0x134   :  { %1189 = vmatprep.subr.mxu0 %v985_v34 }
 0x135   :  { %1190 = vmatpush3.msra.mxu0 %v969_v36 }
 0x136   :  { %1191 = vmatprep.subr.mxu0 %v984_v37 }
 0x137   :  { %1192 = vmatpush3.msra.mxu0 %v968_v39 }
 0x138   :  { %1193 = vmatprep.subr.mxu0 %v983_v41 }
 0x1ea   :  { %v734_v45 = vpop.f32.mrf.mxu0 }
 0x1eb   :  { %v735_v47 = vadd.f32 %v734_v45, %v661_v42  ;;  %v967_v42 = vld [vmem:[%s1843_s9 + $0x40] sm:$0xff]  ;;  %v981_v45 = vld [vmem:[%s1843_s9 + $0xb0] sm:$0xff] }
 0x1ec   :  { %v736_v48 = vpop.f32.mrf.mxu0  ;;  %1194 = vmatpush3.msra.mxu0 %v967_v42 }
 0x1ed   :  { %v739_v49 = vmax.f32 %v735_v47, 0.0  ;;  %v737_v50 = vadd.f32 %v736_v48, %v665_v44  ;;  %v966_v44 = vld [vmem:[%s1843_s9 + $0x38] sm:$0xff]  ;;  %1195 = vmatprep.subr.mxu0 %v982_v43  ;;  %v980_v47 = vld [vmem:[%s1843_s9 + $0xa8] sm:$0xff] }
 0x1ee   :  { %1196 = vmatpush3.msra.mxu0 %v966_v44  ;;  %v964_v48 = vld [vmem:[%s1843_s9 + $0x28] sm:$0xff] }
 0x1ef   :  { %742 = vrot.lane.b32.xlu0 %v739_v49, %s1455_s4  ;;  %v740_v51 = vmax.f32 %v737_v50, 0.0  ;;  %1197 = vmatprep.subr.mxu0 %v981_v45  ;;  %v963_v50 = vld [vmem:[%s1843_s9 + $0x20] sm:$0xff] }
 0x1f0   :  { %1198 = vmatpush3.msra.mxu0 %v965_v46 }
 0x1f1   :  { %1199 = vmatprep.subr.mxu0 %v980_v47 }
 0x1f2   :  { %1200 = vmatpush3.msra.mxu0 %v964_v48 }
 0x1f3   :  { %747 = vrot.lane.b32.xlu0 %v740_v51, %s1455_s4 }
 0x261   :  { %v743_v52 = vpop.permute.xlu0 %742 }
 0x262   :  { %v745_v54 = vmax.f32 %v739_v49, %v743_v52  ;;  %v979_v49 = vld [vmem:[%s1843_s9 + $0xa0] sm:$0xff] }
 0x263   :  { %1201 = vmatprep.subr.mxu0 %v979_v49 }
 0x264   :  { %1202 = vmatpush3.msra.mxu0 %v963_v50 }
 0x265   :  { %v748_v53 = vpop.permute.xlu0 %747 }
 0x266   :  { %v750_v55 = vmax.f32 %v740_v51, %v748_v53  ;;  %v1137_v51 = vld [vmem:[#allocation7] ss:$0 sm:$0xff] }
 0x268   :  { %v751_v56 = vmax.f32 %v745_v54, %v750_v55 }
 0x26a   :  { %1297 = vmatmul.mubr.msk.f32.vlgmr.msra.gmra.mxu1 %vm767_vm3, %v751_v56  ;;  %v978_v56 = vld [vmem:[%s1843_s9 + $0x98] sm:$0xff] }
 0x26b   :  { %887 = vmatpush1.msra.mxu1 %v872_v57  ;;  %950 = vmatprep.mubr.f32.mxu1 %v1453_v0  ;;  %v859_v0 = vld [vmem:[#allocation8 + $0x88] sm:$0xff]  ;;  %v962_v57 = vld [vmem:[%s1843_s9 + $0x18] sm:$0xff] }
 0x26c   :  { %888 = vmatprep.subr.mxu1 %v871_v58  ;;  %1203 = vmatprep.subr.mxu0 %v978_v56  ;;  %v977_v58 = vld [vmem:[%s1843_s9 + $0x90] sm:$0xff] }
 0x26d   :  { %889 = vmatpush1.msra.mxu1 %v870_v59  ;;  %1204 = vmatpush3.msra.mxu0 %v962_v57  ;;  %v961_v59 = vld [vmem:[%s1843_s9 + $0x10] sm:$0xff] }
 0x26e   :  { %890 = vmatprep.subr.mxu1 %v869_v60  ;;  %1205 = vmatprep.subr.mxu0 %v977_v58  ;;  %v976_v60 = vld [vmem:[%s1843_s9 + $0x88] sm:$0xff] }
 0x26f   :  { %891 = vmatpush1.msra.mxu1 %v868_v61  ;;  %1206 = vmatpush3.msra.mxu0 %v961_v59  ;;  %v960_v61 = vld [vmem:[%s1843_s9 + $0x8] sm:$0xff] }
 0x270   :  { %892 = vmatprep.subr.mxu1 %v867_v62  ;;  %1207 = vmatprep.subr.mxu0 %v976_v60  ;;  %v975_v62 = vld [vmem:[%s1843_s9 + $0x80] sm:$0xff] }
 0x271   :  { %893 = vmatpush1.msra.mxu1 %v866_v63  ;;  %1208 = vmatpush3.msra.mxu0 %v960_v61  ;;  %v959_v63 = vld [vmem:[%s1843_s9] sm:$0xff] }
 0x272   :  { %894 = vmatprep.subr.mxu1 %v865_v1  ;;  %1209 = vmatprep.subr.mxu0 %v975_v62  ;;  %v874_v1 = vld [vmem:[#allocation10] sm:$0x3] }
 0x273   :  { %895 = vmatpush1.msra.mxu1 %v864_v2  ;;  %1210 = vmatpush3.msra.mxu0 %v959_v63  ;;  %v879_v2 = vrot.slane %v874_v1, %v660_v38 }
 0x274   :  { %896 = vmatprep.subr.mxu1 %v863_v3  ;;  %v883_v3 = vrot.slane %v874_v1, %v664_v40 }
 0x275   :  { %897 = vmatpush1.msra.mxu1 %v862_v4 }
 0x276   :  { %898 = vmatprep.subr.mxu1 %v861_v5 }
 0x277   :  { %899 = vmatpush1.msra.mxu1 %v860_v6 }
 0x278   :  { %900 = vmatprep.subr.mxu1 %v859_v0 }
 0x279   :  { %901 = vmatpush1.msra.mxu1 %v858_v7 }
 0x27a   :  { %902 = vmatprep.subr.mxu1 %v857_v8 }
 0x27b   :  { %903 = vmatpush1.msra.mxu1 %v856_v9 }
 0x27c   :  { %904 = vmatprep.subr.mxu1 %v855_v10 }
 0x27d   :  { %905 = vmatpush1.msra.mxu1 %v854_v11  ;;  %v1139_v11 = vld [vmem:[%s1844_s10] ss:$0 sm:$0xff] }
 0x27e   :  { %906 = vmatprep.subr.mxu1 %v853_v12 }
 0x27f   :  { %907 = vmatpush1.msra.mxu1 %v852_v13 }
 0x280   :  { %908 = vmatprep.subr.mxu1 %v851_v14 }
 0x281   :  { %909 = vmatpush1.msra.mxu1 %v850_v15 }
 0x282   :  { %910 = vmatprep.subr.mxu1 %v849_v16 }
 0x283   :  { %911 = vmatpush1.msra.mxu1 %v848_v17 }
 0x284   :  { %912 = vmatprep.subr.mxu1 %v847_v18 }
 0x285   :  { %913 = vmatpush1.msra.mxu1 %v846_v19 }
 0x286   :  { %914 = vmatprep.subr.mxu1 %v845_v20 }
 0x287   :  { %915 = vmatpush1.msra.mxu1 %v844_v21 }
 0x288   :  { %916 = vmatprep.subr.mxu1 %v843_v22 }
 0x289   :  { %917 = vmatpush1.msra.mxu1 %v842_v23 }
 0x32a   :  { %v837_v52 = vpop.f32.mrf.mxu1 }
 0x32b   :  { %v838_v53 = vadd.f32 %v1137_v51, %v837_v52 }
 0x32c   :  { %v1298_v54 = vpop.f32.mrf.mxu1 }
 0x32d   :  { %v841_v55 = vmax.f32 %v838_v53, 0.0 }
 0x32f   :  { %951 = vmatmul.mubr.f32.vlgmr.msra.gmra.mxu1 %v841_v55 }
 0x3ef   :  { %v952_v4 = vpop.f32.mrf.mxu1 }
 0x3f0   :  { %v953_v5 = vadd.f32 %v952_v4, %v879_v2 }
 0x3f1   :  { %v954_v6 = vpop.f32.mrf.mxu1 }
 0x3f2   :  { %v955_v0 = vadd.f32 %v954_v6, %v883_v3  ;;  %v957_v8 = vmax.f32 %v953_v5, 0.0 }
 0x3f4   :  { %v958_v7 = vmax.f32 %v955_v0, 0.0 }
 0x3f6   :  { %1062 = vmatprep.mubr.f32.mxu0 %v958_v7 }
 0x3f7   :  { %1063 = vmatmul.mubr.f32.vlgmr.msra.gmra.mxu0 %v957_v8 }
 0x4b7   :  { %v1211_v9 = vpop.f32.mrf.mxu0 }
 0x4b9   :  { %v1212_v10 = vpop.f32.mrf.mxu0 }
 0x4ba   :  { %v1213_v12 = vadd.f32 %v1212_v10, %v1211_v9 }
 0x4bc   :  { %v1065_v13 = vadd.f32 %v1213_v12, %v1139_v11 }
 0x4be   :  { %1068 = vxpose.xlu1.b32.start.end [1/1] (short) (narrow) %v1065_v13, 8 }
 0x53a   :  { %v1084_v35 = vpop.trf.xlu1 }
 0x53b   :  { %1101 = vst.msk [vmem:[#allocation11] sm:$0xff] %vm1100_vm4, %v1084_v35 }
 0x53c   :  { %1425 = shalt.err (!%p1422_p1)
}
 0x53d   :  { %1111 = dma.vmem_to_hbm [thread:$0]  %s1109_s17, 128, %s1845_s11, [#allocation4]  }
 0x53e   :  { %1440 = dma.done.wait [#allocation4], 128  }
 0x53f   :  { %1441 = vsyncadd [#allocation4], 4294967168 }
 0x540   :  { %1115 = vsyncpa [#allocation3], 1 }
 0x541   :  { %1116 = vsyncpa [#allocation6], 1 }
 0x542   :  { %1117 = vsyncpa [#allocation9], 1 }
 0x543   :  { %1118 = vsyncpa [#allocation4], 1 }

</bundles_post_ra>
